<compile_context>
chip_gen: v5e
topology: v5e:2x2
jax: 0.10.0
libtpu: 0.0.40
codegen_flags: <defaults>
</compile_context>

<pallas_src>
import functools

import jax
import jax.numpy as jnp
from jax.experimental import pallas as pl
from jax.experimental.pallas import tpu as pltpu

ALPHA = 0.95
BN_EPS = 1e-5
LANE = 128  # pad every channel axis to one full 128-lane vreg width

_VMEM = pl.BlockSpec(memory_space=pltpu.MemorySpace.VMEM)


# ---------------------------------------------------------------------------
# Fused kernel: conv1->seq1->conv2->seq2->conv3->seq3->dropout->head->sigmoid
# ---------------------------------------------------------------------------
def _gcn_fused_kernel(a_ref, x_ref,
                      wnr1_ref, b1_ref, wl1_ref, bl1_ref,
                      wnr2_ref, b2_ref, wl2_ref, bl2_ref,
                      wnr3_ref, b3_ref, wl3_ref, bl3_ref,
                      wh_ref, bh_ref,
                      o_ref):
    """Whole GCNConvNet forward in one kernel (inference mode).

    Per block:
        hc = h @ [alpha*Wn*s | Wr*s]                 # one K=128 matmul, N=256
        z  = A @ hc[:, :128] + hc[:, 128:] + b       # folded MFConv + BN
        h  = ReLU( ReLU(z) @ Wl + bl )               # seq Linear + ReLUs
    Head:
        out = sigmoid( h @ (W1@W2@Wout) + folded bias )
      (exact: the reference applies no activation between the three head
       Linears; Dropout(0.5) is identity in eval mode.)
    """
    a = a_ref[...]                        # bf16 [N, N], A[dst, src] = 1
    h = x_ref[...]                        # bf16 [N, LANE]
    blocks = ((wnr1_ref, b1_ref, wl1_ref, bl1_ref),
              (wnr2_ref, b2_ref, wl2_ref, bl2_ref),
              (wnr3_ref, b3_ref, wl3_ref, bl3_ref))
    for wnr_ref, b_ref, wl_ref, bl_ref in blocks:          # static unroll (3)
        # Neighbor + root transforms share one matmul (weights pre-concatenated
        # offline along the output axis -> no runtime lane concat).
        hc = jnp.dot(h, wnr_ref[...],
                     preferred_element_type=jnp.float32)   # [N, 2*LANE] f32
        hn = hc[:, :LANE].astype(jnp.bfloat16)             # lane-tile-aligned slice
        # MFConv sum-aggregation over neighbors:  A @ (h @ alpha*Wn).
        z = (jnp.dot(a, hn, preferred_element_type=jnp.float32)
             + hc[:, LANE:] + b_ref[...])                  # conv + BN folded
        z = jnp.maximum(z, 0.0)                            # ReLU (f32 VPU)
        z = jnp.dot(z.astype(jnp.bfloat16), wl_ref[...],
                    preferred_element_type=jnp.float32) + bl_ref[...]   # seq Linear
        h = jnp.maximum(z, 0.0).astype(jnp.bfloat16)       # ReLU -> next layer
    # Fused head: dropout(identity) -> linear1 -> linear2 -> out -> sigmoid.
    logits = jnp.dot(h, wh_ref[...],
                     preferred_element_type=jnp.float32) + bh_ref[...]
    o_ref[...] = jax.nn.sigmoid(logits)                    # lane-dense f32 store


def _gcn_fused_call(folded, x_pad, adj):
    n = x_pad.shape[0]
    args = [adj, x_pad]
    for i in (1, 2, 3):
        blk = folded[f"block{i}"]
        args += [blk["w_nr"], blk["b"], blk["wl"], blk["bl"]]
    args += [folded["w_head"], folded["b_head"]]
    return pl.pallas_call(
        _gcn_fused_kernel,
        out_shape=jax.ShapeDtypeStruct((n, LANE), jnp.float32),
        in_specs=[_VMEM] * len(args),
        out_specs=_VMEM,
    )(*args)


@functools.partial(jax.jit, static_argnames=("out_channels",))
def gcn_forward(folded, x, adj, out_channels=6):
    n, c0 = x.shape
    x_pad = jnp.zeros((n, LANE), jnp.bfloat16).at[:, :c0].set(x.astype(jnp.bfloat16))
    out_pad = _gcn_fused_call(folded, x_pad, adj.astype(jnp.bfloat16))
    return out_pad[:, :out_channels]


# ---------------------------------------------------------------------------
# Parameter construction ("PyTorch-shaped", f32) + offline folding/padding
# ---------------------------------------------------------------------------
def init_params(key, in_channels=3, out_channels=6):
    c0 = in_channels
    c1, c2, c3 = 4 * c0, 8 * c0, 16 * c0
    keys = iter(jax.random.split(key, 32))

    def dense(ci, co):
        w = 0.1 * jax.random.normal(next(keys), (ci, co), jnp.float32)
        b = 0.05 * jax.random.normal(next(keys), (1, co), jnp.float32)
        return w, b

    def bn(c):
        gamma = 1.0 + 0.1 * jax.random.normal(next(keys), (1, c), jnp.float32)
        beta = 0.05 * jax.random.normal(next(keys), (1, c), jnp.float32)
        run_mean = jnp.zeros((1, c), jnp.float32)   # PyTorch defaults
        run_var = jnp.ones((1, c), jnp.float32)
        scale = gamma * jax.lax.rsqrt(run_var + BN_EPS)
        shift = beta - run_mean * scale
        return scale, shift

    params = {}
    for i, (ci, co) in enumerate([(c0, c1), (c1, c2), (c2, c3)], start=1):
        wn, bc = dense(ci, co)
        wr, _ = dense(ci, co)   # TODO(synk): MFConv here uses one shared bias (bc)
        bn_scale, bn_shift = bn(co)
        wl, bl = dense(co, co)
        params[f"block{i}"] = dict(wn=wn, wr=wr, bc=bc,
                                   bn_scale=bn_scale, bn_shift=bn_shift,
                                   wl=wl, bl=bl)
    params["linear1"] = dense(c3, c2)
    params["linear2"] = dense(c2, c1)
    params["out"] = dense(c1, out_channels)
    return params


def fold_and_pad_params(params, in_channels=3, out_channels=6):
    """Fold alpha/BN into conv weights, collapse the head, pad lanes, cast bf16."""
    c0 = in_channels
    dims = [(c0, 4 * c0), (4 * c0, 8 * c0), (8 * c0, 16 * c0)]
    folded = {}
    for i, (ci, co) in enumerate(dims, start=1):
        p = params[f"block{i}"]
        s, t = p["bn_scale"], p["bn_shift"]                 # eval-mode BN -> scale/shift
        wn_f = ALPHA * p["wn"] * s                          # column-scale by BN
        wr_f = p["wr"] * s
        b_f = p["bc"] * s + t
        # Offline output-axis concat: h @ w_nr -> [h@(alpha*Wn*s) | h@(Wr*s)].
        w_nr = (jnp.zeros((LANE, 2 * LANE), jnp.float32)
                .at[:ci, :co].set(wn_f)
                .at[:ci, LANE:LANE + co].set(wr_f))
        b_p = jnp.zeros((1, LANE), jnp.float32).at[:, :co].set(b_f)
        wl_p = jnp.zeros((LANE, LANE), jnp.float32).at[:co, :co].set(p["wl"])
        bl_p = jnp.zeros((1, LANE), jnp.float32).at[:, :co].set(p["bl"])
        folded[f"block{i}"] = dict(w_nr=w_nr.astype(jnp.bfloat16), b=b_p,
                                   wl=wl_p.astype(jnp.bfloat16), bl=bl_p)
    # Head: linear1 -> linear2 -> out collapsed into one matmul + bias (exact).
    (w1, b1), (w2, b2), (w3, b3) = params["linear1"], params["linear2"], params["out"]
    w_head = w1 @ w2 @ w3
    b_head = (b1 @ w2 + b2) @ w3 + b3
    c3 = 16 * c0
    wh = jnp.zeros((LANE, LANE), jnp.float32).at[:c3, :out_channels].set(w_head)
    bh = jnp.zeros((1, LANE), jnp.float32).at[:, :out_channels].set(b_head)
    folded["w_head"] = wh.astype(jnp.bfloat16)
    folded["b_head"] = bh
    return folded


# ---------------------------------------------------------------------------
# Pure-JAX f32 reference (eval mode) for correctness checking
# ---------------------------------------------------------------------------
def reference_forward(params, x, adj, out_channels=6):
    h = x
    for i in (1, 2, 3):
        p = params[f"block{i}"]
        z = ALPHA * (adj @ h) @ p["wn"] + h @ p["wr"] + p["bc"]   # MFConv
        z = z * p["bn_scale"] + p["bn_shift"]                      # BN (eval)
        z = jnp.maximum(z, 0.0)                                    # ReLU
        z = z @ p["wl"] + p["bl"]                                  # Linear
        h = jnp.maximum(z, 0.0)                                    # ReLU
    (w1, b1), (w2, b2), (w3, b3) = params["linear1"], params["linear2"], params["out"]
    logits = ((h @ w1 + b1) @ w2 + b2) @ w3 + b3                   # dropout = identity
    return jax.nn.sigmoid(logits)


# ---------------------------------------------------------------------------
# Example run
# ---------------------------------------------------------------------------
if __name__ == "__main__":
    key = jax.random.PRNGKey(0)
    k_param, k_x = jax.random.split(key)

    in_channels, out_channels = 3, 6
    num_nodes = 16

    params = init_params(k_param, in_channels, out_channels)
    folded = fold_and_pad_params(params, in_channels, out_channels)

    # Node features [N, C0]
    x = jax.random.normal(k_x, (num_nodes, in_channels), jnp.float32)

    # Deterministic small graph: bidirectional ring + a couple of chords.
    src = jnp.concatenate([
        jnp.arange(num_nodes), (jnp.arange(num_nodes) + 1) % num_nodes,
        jnp.array([0, 8, 3, 11]),
    ])
    dst = jnp.concatenate([
        (jnp.arange(num_nodes) + 1) % num_nodes, jnp.arange(num_nodes),
        jnp.array([8, 0, 11, 3]),
    ])
    edge_index = jnp.stack([src, dst])  # [2, E], messages flow src -> dst

    # Dense adjacency for sum aggregation: A[dst, src] = 1 => (A @ X)[v] = sum_{u->v} x_u
    adj = jnp.zeros((num_nodes, num_nodes), jnp.float32).at[
        edge_index[1], edge_index[0]].set(1.0)

    out = gcn_forward(folded, x, adj, out_channels=out_channels)
    out = jax.block_until_ready(out)

    assert out.shape == (num_nodes, out_channels)
    assert bool(jnp.all(jnp.isfinite(out)))
    assert bool(jnp.all((out >= 0.0) & (out <= 1.0)))  # sigmoid output range

    ref = reference_forward(params, x, adj, out_channels)
    max_err = float(jnp.max(jnp.abs(out - ref)))
    assert max_err < 6e-2, f"kernel vs f32 reference max abs error {max_err}"
    print("KERNEL_OK")
</pallas_src>

<mosaic_0001>
module attributes {stable_mosaic.version = 11 : i64} {
  func.func @_gcn_fused_kernel(%arg0: memref<16x16xbf16, #tpu.memory_space<vmem>>, %arg1: memref<16x128xbf16, #tpu.memory_space<vmem>>, %arg2: memref<128x256xbf16, #tpu.memory_space<vmem>>, %arg3: memref<1x128xf32, #tpu.memory_space<vmem>>, %arg4: memref<128x128xbf16, #tpu.memory_space<vmem>>, %arg5: memref<1x128xf32, #tpu.memory_space<vmem>>, %arg6: memref<128x256xbf16, #tpu.memory_space<vmem>>, %arg7: memref<1x128xf32, #tpu.memory_space<vmem>>, %arg8: memref<128x128xbf16, #tpu.memory_space<vmem>>, %arg9: memref<1x128xf32, #tpu.memory_space<vmem>>, %arg10: memref<128x256xbf16, #tpu.memory_space<vmem>>, %arg11: memref<1x128xf32, #tpu.memory_space<vmem>>, %arg12: memref<128x128xbf16, #tpu.memory_space<vmem>>, %arg13: memref<1x128xf32, #tpu.memory_space<vmem>>, %arg14: memref<128x128xbf16, #tpu.memory_space<vmem>>, %arg15: memref<1x128xf32, #tpu.memory_space<vmem>>, %arg16: memref<16x128xf32, #tpu.memory_space<vmem>>) attributes {dimension_semantics = [], scalar_prefetch = 0 : i64, scratch_operands = 0 : i64, tpu.core_type = #tpu.core_type<tc>} {
    %c0 = arith.constant 0 : index
    %c0_0 = arith.constant 0 : index
    %0 = vector.load %arg0[%c0, %c0_0] : memref<16x16xbf16, #tpu.memory_space<vmem>>, vector<16x16xbf16>
    %c0_1 = arith.constant 0 : index
    %c0_2 = arith.constant 0 : index
    %1 = vector.load %arg1[%c0_1, %c0_2] : memref<16x128xbf16, #tpu.memory_space<vmem>>, vector<16x128xbf16>
    %c0_3 = arith.constant 0 : index
    %c0_4 = arith.constant 0 : index
    %2 = vector.load %arg2[%c0_3, %c0_4] : memref<128x256xbf16, #tpu.memory_space<vmem>>, vector<128x256xbf16>
    %cst = arith.constant dense<0.000000e+00> : vector<16x256xf32>
    %3 = tpu.matmul %1, %2, %cst {dimension_numbers = #tpu.dot_dimension_numbers<[1], [0], [0], [1], [0, 0, 1, 1], [], []>} : vector<16x128xbf16>, vector<128x256xbf16>, vector<16x256xf32> -> vector<16x256xf32>
    %4 = vector.extract_strided_slice %3 {offsets = [0, 0], sizes = [16, 128], strides = [1, 1]} : vector<16x256xf32> to vector<16x128xf32>
    %5 = arith.truncf %4 : vector<16x128xf32> to vector<16x128xbf16>
    %cst_5 = arith.constant dense<0.000000e+00> : vector<16x128xf32>
    %6 = tpu.matmul %0, %5, %cst_5 {dimension_numbers = #tpu.dot_dimension_numbers<[1], [0], [0], [1], [0, 0, 1, 1], [], []>} : vector<16x16xbf16>, vector<16x128xbf16>, vector<16x128xf32> -> vector<16x128xf32>
    %7 = vector.extract_strided_slice %3 {offsets = [0, 128], sizes = [16, 128], strides = [1, 1]} : vector<16x256xf32> to vector<16x128xf32>
    %8 = arith.addf %6, %7 : vector<16x128xf32>
    %c0_6 = arith.constant 0 : index
    %c0_7 = arith.constant 0 : index
    %9 = vector.load %arg3[%c0_6, %c0_7] : memref<1x128xf32, #tpu.memory_space<vmem>>, vector<1x128xf32>
    %10 = vector.broadcast %9 : vector<1x128xf32> to vector<16x128xf32>
    %11 = arith.addf %8, %10 : vector<16x128xf32>
    %cst_8 = arith.constant 0.000000e+00 : f32
    %12 = vector.broadcast %cst_8 : f32 to vector<16x128xf32>
    %13 = arith.maximumf %11, %12 : vector<16x128xf32>
    %14 = arith.truncf %13 : vector<16x128xf32> to vector<16x128xbf16>
    %c0_9 = arith.constant 0 : index
    %c0_10 = arith.constant 0 : index
    %15 = vector.load %arg4[%c0_9, %c0_10] : memref<128x128xbf16, #tpu.memory_space<vmem>>, vector<128x128xbf16>
    %cst_11 = arith.constant dense<0.000000e+00> : vector<16x128xf32>
    %16 = tpu.matmul %14, %15, %cst_11 {dimension_numbers = #tpu.dot_dimension_numbers<[1], [0], [0], [1], [0, 0, 1, 1], [], []>} : vector<16x128xbf16>, vector<128x128xbf16>, vector<16x128xf32> -> vector<16x128xf32>
    %c0_12 = arith.constant 0 : index
    %c0_13 = arith.constant 0 : index
    %17 = vector.load %arg5[%c0_12, %c0_13] : memref<1x128xf32, #tpu.memory_space<vmem>>, vector<1x128xf32>
    %18 = vector.broadcast %17 : vector<1x128xf32> to vector<16x128xf32>
    %19 = arith.addf %16, %18 : vector<16x128xf32>
    %cst_14 = arith.constant 0.000000e+00 : f32
    %20 = vector.broadcast %cst_14 : f32 to vector<16x128xf32>
    %21 = arith.maximumf %19, %20 : vector<16x128xf32>
    %22 = arith.truncf %21 : vector<16x128xf32> to vector<16x128xbf16>
    %c0_15 = arith.constant 0 : index
    %c0_16 = arith.constant 0 : index
    %23 = vector.load %arg6[%c0_15, %c0_16] : memref<128x256xbf16, #tpu.memory_space<vmem>>, vector<128x256xbf16>
    %cst_17 = arith.constant dense<0.000000e+00> : vector<16x256xf32>
    %24 = tpu.matmul %22, %23, %cst_17 {dimension_numbers = #tpu.dot_dimension_numbers<[1], [0], [0], [1], [0, 0, 1, 1], [], []>} : vector<16x128xbf16>, vector<128x256xbf16>, vector<16x256xf32> -> vector<16x256xf32>
    %25 = vector.extract_strided_slice %24 {offsets = [0, 0], sizes = [16, 128], strides = [1, 1]} : vector<16x256xf32> to vector<16x128xf32>
    %26 = arith.truncf %25 : vector<16x128xf32> to vector<16x128xbf16>
    %cst_18 = arith.constant dense<0.000000e+00> : vector<16x128xf32>
    %27 = tpu.matmul %0, %26, %cst_18 {dimension_numbers = #tpu.dot_dimension_numbers<[1], [0], [0], [1], [0, 0, 1, 1], [], []>} : vector<16x16xbf16>, vector<16x128xbf16>, vector<16x128xf32> -> vector<16x128xf32>
    %28 = vector.extract_strided_slice %24 {offsets = [0, 128], sizes = [16, 128], strides = [1, 1]} : vector<16x256xf32> to vector<16x128xf32>
    %29 = arith.addf %27, %28 : vector<16x128xf32>
    %c0_19 = arith.constant 0 : index
    %c0_20 = arith.constant 0 : index
    %30 = vector.load %arg7[%c0_19, %c0_20] : memref<1x128xf32, #tpu.memory_space<vmem>>, vector<1x128xf32>
    %31 = vector.broadcast %30 : vector<1x128xf32> to vector<16x128xf32>
    %32 = arith.addf %29, %31 : vector<16x128xf32>
    %cst_21 = arith.constant 0.000000e+00 : f32
    %33 = vector.broadcast %cst_21 : f32 to vector<16x128xf32>
    %34 = arith.maximumf %32, %33 : vector<16x128xf32>
    %35 = arith.truncf %34 : vector<16x128xf32> to vector<16x128xbf16>
    %c0_22 = arith.constant 0 : index
    %c0_23 = arith.constant 0 : index
    %36 = vector.load %arg8[%c0_22, %c0_23] : memref<128x128xbf16, #tpu.memory_space<vmem>>, vector<128x128xbf16>
    %cst_24 = arith.constant dense<0.000000e+00> : vector<16x128xf32>
    %37 = tpu.matmul %35, %36, %cst_24 {dimension_numbers = #tpu.dot_dimension_numbers<[1], [0], [0], [1], [0, 0, 1, 1], [], []>} : vector<16x128xbf16>, vector<128x128xbf16>, vector<16x128xf32> -> vector<16x128xf32>
    %c0_25 = arith.constant 0 : index
    %c0_26 = arith.constant 0 : index
    %38 = vector.load %arg9[%c0_25, %c0_26] : memref<1x128xf32, #tpu.memory_space<vmem>>, vector<1x128xf32>
    %39 = vector.broadcast %38 : vector<1x128xf32> to vector<16x128xf32>
    %40 = arith.addf %37, %39 : vector<16x128xf32>
    %cst_27 = arith.constant 0.000000e+00 : f32
    %41 = vector.broadcast %cst_27 : f32 to vector<16x128xf32>
    %42 = arith.maximumf %40, %41 : vector<16x128xf32>
    %43 = arith.truncf %42 : vector<16x128xf32> to vector<16x128xbf16>
    %c0_28 = arith.constant 0 : index
    %c0_29 = arith.constant 0 : index
    %44 = vector.load %arg10[%c0_28, %c0_29] : memref<128x256xbf16, #tpu.memory_space<vmem>>, vector<128x256xbf16>
    %cst_30 = arith.constant dense<0.000000e+00> : vector<16x256xf32>
    %45 = tpu.matmul %43, %44, %cst_30 {dimension_numbers = #tpu.dot_dimension_numbers<[1], [0], [0], [1], [0, 0, 1, 1], [], []>} : vector<16x128xbf16>, vector<128x256xbf16>, vector<16x256xf32> -> vector<16x256xf32>
    %46 = vector.extract_strided_slice %45 {offsets = [0, 0], sizes = [16, 128], strides = [1, 1]} : vector<16x256xf32> to vector<16x128xf32>
    %47 = arith.truncf %46 : vector<16x128xf32> to vector<16x128xbf16>
    %cst_31 = arith.constant dense<0.000000e+00> : vector<16x128xf32>
    %48 = tpu.matmul %0, %47, %cst_31 {dimension_numbers = #tpu.dot_dimension_numbers<[1], [0], [0], [1], [0, 0, 1, 1], [], []>} : vector<16x16xbf16>, vector<16x128xbf16>, vector<16x128xf32> -> vector<16x128xf32>
    %49 = vector.extract_strided_slice %45 {offsets = [0, 128], sizes = [16, 128], strides = [1, 1]} : vector<16x256xf32> to vector<16x128xf32>
    %50 = arith.addf %48, %49 : vector<16x128xf32>
    %c0_32 = arith.constant 0 : index
    %c0_33 = arith.constant 0 : index
    %51 = vector.load %arg11[%c0_32, %c0_33] : memref<1x128xf32, #tpu.memory_space<vmem>>, vector<1x128xf32>
    %52 = vector.broadcast %51 : vector<1x128xf32> to vector<16x128xf32>
    %53 = arith.addf %50, %52 : vector<16x128xf32>
    %cst_34 = arith.constant 0.000000e+00 : f32
    %54 = vector.broadcast %cst_34 : f32 to vector<16x128xf32>
    %55 = arith.maximumf %53, %54 : vector<16x128xf32>
    %56 = arith.truncf %55 : vector<16x128xf32> to vector<16x128xbf16>
    %c0_35 = arith.constant 0 : index
    %c0_36 = arith.constant 0 : index
    %57 = vector.load %arg12[%c0_35, %c0_36] : memref<128x128xbf16, #tpu.memory_space<vmem>>, vector<128x128xbf16>
    %cst_37 = arith.constant dense<0.000000e+00> : vector<16x128xf32>
    %58 = tpu.matmul %56, %57, %cst_37 {dimension_numbers = #tpu.dot_dimension_numbers<[1], [0], [0], [1], [0, 0, 1, 1], [], []>} : vector<16x128xbf16>, vector<128x128xbf16>, vector<16x128xf32> -> vector<16x128xf32>
    %c0_38 = arith.constant 0 : index
    %c0_39 = arith.constant 0 : index
    %59 = vector.load %arg13[%c0_38, %c0_39] : memref<1x128xf32, #tpu.memory_space<vmem>>, vector<1x128xf32>
    %60 = vector.broadcast %59 : vector<1x128xf32> to vector<16x128xf32>
    %61 = arith.addf %58, %60 : vector<16x128xf32>
    %cst_40 = arith.constant 0.000000e+00 : f32
    %62 = vector.broadcast %cst_40 : f32 to vector<16x128xf32>
    %63 = arith.maximumf %61, %62 : vector<16x128xf32>
    %64 = arith.truncf %63 : vector<16x128xf32> to vector<16x128xbf16>
    %c0_41 = arith.constant 0 : index
    %c0_42 = arith.constant 0 : index
    %65 = vector.load %arg14[%c0_41, %c0_42] : memref<128x128xbf16, #tpu.memory_space<vmem>>, vector<128x128xbf16>
    %cst_43 = arith.constant dense<0.000000e+00> : vector<16x128xf32>
    %66 = tpu.matmul %64, %65, %cst_43 {dimension_numbers = #tpu.dot_dimension_numbers<[1], [0], [0], [1], [0, 0, 1, 1], [], []>} : vector<16x128xbf16>, vector<128x128xbf16>, vector<16x128xf32> -> vector<16x128xf32>
    %c0_44 = arith.constant 0 : index
    %c0_45 = arith.constant 0 : index
    %67 = vector.load %arg15[%c0_44, %c0_45] : memref<1x128xf32, #tpu.memory_space<vmem>>, vector<1x128xf32>
    %68 = vector.broadcast %67 : vector<1x128xf32> to vector<16x128xf32>
    %69 = arith.addf %66, %68 : vector<16x128xf32>
    %70 = arith.negf %69 : vector<16x128xf32>
    %71 = math.exp %70 : vector<16x128xf32>
    %cst_46 = arith.constant 1.000000e+00 : f32
    %72 = vector.broadcast %cst_46 : f32 to vector<16x128xf32>
    %73 = arith.addf %72, %71 : vector<16x128xf32>
    %74 = arith.divf %72, %73 : vector<16x128xf32>
    %c0_47 = arith.constant 0 : index
    %c0_48 = arith.constant 0 : index
    %75 = vector.load %arg16[%c0_47, %c0_48] : memref<16x128xf32, #tpu.memory_space<vmem>>, vector<16x128xf32>
    tpu.vector_store %arg16[%c0_47, %c0_48], %74 {strides = array<i32>} : memref<16x128xf32, #tpu.memory_space<vmem>>, vector<16x128xf32>,
    return
  }
}

</mosaic_0001>

<bundles_post_ra>
// kernel: gcn_forward.1
= control target key start
LH: loop header
LB: loop body
LE: loop exit
PB: predicated region body
PF: predicated region fallthrough
CT: control target
= control target key end

     0   :  { %s1798_s0 = inlined_call_operand.vmem [shape: bf16[16,16], index: 0, kind: input, shape index: {}]   ;;  %s1799_s1 = inlined_call_operand.vmem [shape: bf16[16,128], index: 1, kind: input, shape index: {}]   ;;  %s1800_s2 = inlined_call_operand.hbm [shape: bf16[128,256], index: 2, kind: input, shape index: {}]   ;;  %s1801_s3 = inlined_call_operand.vmem [shape: f32[1,128], index: 3, kind: input, shape index: {}]   ;;  %s1802_s4 = inlined_call_operand.hbm [shape: bf16[128,128], index: 4, kind: input, shape index: {}]   ;;  %s1803_s5 = inlined_call_operand.vmem [shape: f32[1,128], index: 5, kind: input, shape index: {}]   ;;  %s1804_s6 = inlined_call_operand.hbm [shape: bf16[128,256], index: 6, kind: input, shape index: {}]   ;;  %s1805_s7 = inlined_call_operand.vmem [shape: f32[1,128], index: 7, kind: input, shape index: {}]   ;;  %s1806_s8 = inlined_call_operand.hbm [shape: bf16[128,128], index: 8, kind: input, shape index: {}]   ;;  %s1807_s9 = inlined_call_operand.vmem [shape: f32[1,128], index: 9, kind: input, shape index: {}]   ;;  %s1808_s10 = inlined_call_operand.hbm [shape: bf16[128,256], index: 10, kind: input, shape index: {}]   ;;  %s1809_s11 = inlined_call_operand.vmem [shape: f32[1,128], index: 11, kind: input, shape index: {}]   ;;  %s1810_s12 = inlined_call_operand.hbm [shape: bf16[128,128], index: 12, kind: input, shape index: {}]   ;;  %s1811_s13 = inlined_call_operand.vmem [shape: f32[1,128], index: 13, kind: input, shape index: {}]   ;;  %s1812_s14 = inlined_call_operand.hbm [shape: bf16[128,128], index: 14, kind: input, shape index: {}]   ;;  %s1813_s15 = inlined_call_operand.vmem [shape: f32[1,128], index: 15, kind: input, shape index: {}]   ;;  %s1814_s16 = inlined_call_operand.vmem [shape: f32[16,128], index: 16, kind: output, shape index: {}]  }
   0x1   :  { %1815 = sst [smem:[#allocation17_spill]] %s1798_s0 }
   0x2   :  { %21 = vsyncpa [#allocation3], 0 }
   0x3   :  { %22 = vsyncpa [#allocation5], 0 }
   0x4   :  { %23 = vsyncpa [#allocation8], 0  ;;  %s48_s23 = sshll.u32 %s1802_s4, 4  ;;  %s49_s23 = int_to_ptr.hbm [resolvable:$true] %s48_s23 }
   0x5   :  { %24 = vsyncpa [#allocation11], 0  ;;  %s1628_s24 = smov [#allocation4]   ;;  %s78_s28 = sshll.u32 %s1806_s8, 4  ;;  %s79_s28 = int_to_ptr.hbm [resolvable:$true] %s78_s28 }
   0x6   :  { %s50_s25 = sshll.u32 %s1628_s24, 4  ;;  %s1629_s29 = smov 64   ;;  %s51_s25 = int_to_ptr.vmem [resolvable:$true] %s50_s25 }
   0x7   :  { %s1630_s30 = smov 4   ;;  %s1631_s0 = smov [#allocation7]  }
   0x8   :  { %56 = dma.hbm_to_vmem [thread:$0]  %s49_s23, 1024, %s51_s25, [#allocation5], %s1629_s29, %s1629_s29, %s1630_s30  }
   0x9   :  { %s80_s17 = sshll.u32 %s1631_s0, 4  ;;  %s108_s19 = sshll.u32 %s1810_s12, 4  ;;  %s81_s17 = int_to_ptr.vmem [resolvable:$true] %s80_s17  ;;  %s109_s19 = int_to_ptr.hbm [resolvable:$true] %s108_s19 }
   0xa   :  { %86 = dma.hbm_to_vmem [thread:$0]  %s79_s28, 1024, %s81_s17, [#allocation8], %s1629_s29, %s1629_s29, %s1630_s30  }
   0xb   :  { %s33_s21 = sshll.u32 %s1800_s2, 4  ;;  %s1632_s22 = smov [#allocation10]   ;;  %s34_s21 = int_to_ptr.hbm [resolvable:$true] %s33_s21 }
   0xc   :  { %s110_s24 = sshll.u32 %s1632_s22, 4  ;;  %s1633_s23 = smov [#allocation2]   ;;  %s111_s24 = int_to_ptr.vmem [resolvable:$true] %s110_s24 }
   0xd   :  { %116 = dma.hbm_to_vmem [thread:$0]  %s109_s19, 1024, %s111_s24, [#allocation11], %s1629_s29, %s1629_s29, %s1630_s30  }
   0xe   :  { %s35_s12 = sshll.u32 %s1633_s23, 4  ;;  %s1634_s25 = smov 128   ;;  %s36_s12 = int_to_ptr.vmem [resolvable:$true] %s35_s12 }
   0xf   :  { %s1635_s26 = smov 8   ;;  %s63_s0 = sshll.u32 %s1804_s6, 4  ;;  %s64_s0 = int_to_ptr.hbm [resolvable:$true] %s63_s0 }
  0x10   :  { %41 = dma.hbm_to_vmem [thread:$0]  %s34_s21, 2048, %s36_s12, [#allocation3], %s1634_s25, %s1634_s25, %s1635_s26  }
  0x11   :  { %s1636_s2 = smov [#allocation6]   ;;  %s93_s8 = sshll.u32 %s1808_s10, 4  ;;  %s94_s8 = int_to_ptr.hbm [resolvable:$true] %s93_s8 }
  0x12   :  { %s65_s17 = sshll.u32 %s1636_s2, 4  ;;  %s1637_s19 = smov [#allocation9]   ;;  %s66_s17 = int_to_ptr.vmem [resolvable:$true] %s65_s17 }
  0x13   :  { %71 = dma.hbm_to_vmem [thread:$0]  %s64_s0, 2048, %s66_s17, [#allocation5], %s1634_s25, %s1634_s25, %s1635_s26  }
  0x14   :  { %s95_s20 = sshll.u32 %s1637_s19, 4  ;;  %s123_s21 = sshll.u32 %s1812_s14, 4  ;;  %s96_s20 = int_to_ptr.vmem [resolvable:$true] %s95_s20  ;;  %s124_s21 = int_to_ptr.hbm [resolvable:$true] %s123_s21 }
  0x15   :  { %101 = dma.hbm_to_vmem [thread:$0]  %s94_s8, 2048, %s96_s20, [#allocation8], %s1634_s25, %s1634_s25, %s1635_s26  }
  0x16   :  { %s1638_s6 = smov [#allocation12]  }
  0x17   :  { %s125_s23 = sshll.u32 %s1638_s6, 4  ;;  %s126_s23 = int_to_ptr.vmem [resolvable:$true] %s125_s23 }
  0x18   :  { %131 = dma.hbm_to_vmem [thread:$0]  %s124_s21, 1024, %s126_s23, [#allocation11], %s1629_s29, %s1629_s29, %s1630_s30  }
  0x19   :  { %1620 = dma.done.wait [#allocation3], 2048  }
  0x1a   :  { %1621 = vsyncadd [#allocation3], 4294965248 }
  0x1b   :  { %1622 = dma.done.wait [#allocation5], 3072  }
  0x1c   :  { %1623 = vsyncadd [#allocation5], 4294964224 }
  0x1d   :  { %1624 = dma.done.wait [#allocation8], 3072  }
  0x1e   :  { %1625 = vsyncadd [#allocation8], 4294964224 }
  0x1f   :  { %1626 = dma.done.wait [#allocation11], 2048  }
  0x20   :  { %1627 = vsyncadd [#allocation11], 4294965248  ;;  %v1073_v0 = vld [vmem:[#allocation2 + $0x70] sm:$0xf]  ;;  %v1361_v1 = vld [vmem:[#allocation2 + $0x74] sm:$0xf0] }
  0x21   :  { %v1065_v2 = vld [vmem:[#allocation2 + $0x60] sm:$0xf]  ;;  %v1074_v3 = vor.u32 %v1361_v1, %v1073_v0  ;;  %v1359_v4 = vld [vmem:[#allocation2 + $0x64] sm:$0xf0]  ;;  %v1057_v6 = vld [vmem:[#allocation2 + $0x50] sm:$0xf] }
  0x22   :  { %v1066_v5 = vor.u32 %v1359_v4, %v1065_v2  ;;  %v1357_v7 = vld [vmem:[#allocation2 + $0x54] sm:$0xf0]  ;;  %v1360_v8 = vld [vmem:[#allocation2 + $0x74] sm:$0xf]  ;;  %v1075_v9 = vld [vmem:[#allocation2 + $0x78] sm:$0xf0] }
  0x23   :  { %269 = vmatpush.bf16.msra.mxu0 %v1074_v3  ;;  %v1358_v10 = vld [vmem:[#allocation2 + $0x64] sm:$0xf]  ;;  %v1067_v11 = vld [vmem:[#allocation2 + $0x68] sm:$0xf0]  ;;  %v1058_v12 = vor.u32 %v1357_v7, %v1057_v6  ;;  %v1078_v13 = vor.u32 %v1360_v8, %v1075_v9  ;;  %v1049_v14 = vld [vmem:[#allocation2 + $0x40] sm:$0xf] }
  0x24   :  { %v1355_v15 = vld [vmem:[#allocation2 + $0x44] sm:$0xf0]  ;;  %v1070_v16 = vor.u32 %v1358_v10, %v1067_v11  ;;  %v1356_v17 = vld [vmem:[#allocation2 + $0x54] sm:$0xf]  ;;  %v1041_v18 = vld [vmem:[#allocation2 + $0x30] sm:$0xf] }
  0x25   :  { %283 = vmatpush.bf16.msra.mxu1 %v1078_v13  ;;  %v1059_v19 = vld [vmem:[#allocation2 + $0x58] sm:$0xf0]  ;;  %v1050_v20 = vor.u32 %v1355_v15, %v1049_v14  ;;  %v1353_v21 = vld [vmem:[#allocation2 + $0x34] sm:$0xf0]  ;;  %v1354_v23 = vld [vmem:[#allocation2 + $0x44] sm:$0xf] }
  0x26   :  { %v1062_v22 = vor.u32 %v1356_v17, %v1059_v19  ;;  %v1051_v24 = vld [vmem:[#allocation2 + $0x48] sm:$0xf0]  ;;  %v1042_v25 = vor.u32 %v1353_v21, %v1041_v18  ;;  %v1033_v26 = vld [vmem:[#allocation2 + $0x20] sm:$0xf]  ;;  %v1351_v27 = vld [vmem:[#allocation2 + $0x24] sm:$0xf0] }
  0x27   :  { %270 = vmatpush.bf16.msra.mxu0 %v1066_v5  ;;  %v1054_v28 = vor.u32 %v1354_v23, %v1051_v24  ;;  %v1352_v29 = vld [vmem:[#allocation2 + $0x34] sm:$0xf]  ;;  %v1043_v30 = vld [vmem:[#allocation2 + $0x38] sm:$0xf0]  ;;  %v1034_v31 = vor.u32 %v1351_v27, %v1033_v26  ;;  %v1025_v32 = vld [vmem:[#allocation2 + $0x10] sm:$0xf] }
  0x28   :  { %v1349_v33 = vld [vmem:[#allocation2 + $0x14] sm:$0xf0]  ;;  %v1046_v34 = vor.u32 %v1352_v29, %v1043_v30  ;;  %v1350_v35 = vld [vmem:[#allocation2 + $0x24] sm:$0xf]  ;;  %v1035_v36 = vld [vmem:[#allocation2 + $0x28] sm:$0xf0] }
  0x29   :  { %284 = vmatpush.bf16.msra.mxu1 %v1070_v16  ;;  %v1026_v37 = vor.u32 %v1349_v33, %v1025_v32  ;;  %v1017_v38 = vld [vmem:[#allocation2] sm:$0xf]  ;;  %v1347_v39 = vld [vmem:[#allocation2 + $0x4] sm:$0xf0]  ;;  %v1038_v40 = vor.u32 %v1350_v35, %v1035_v36  ;;  %v1348_v41 = vld [vmem:[#allocation2 + $0x14] sm:$0xf] }
  0x2a   :  { %v1027_v42 = vld [vmem:[#allocation2 + $0x18] sm:$0xf0]  ;;  %v1018_v43 = vor.u32 %v1347_v39, %v1017_v38  ;;  %v1345_v45 = vld [vmem:[%s1799_s1] sm:$0xff]  ;;  %v1019_v47 = vld [vmem:[#allocation2 + $0x8] sm:$0xf0]  ;;  %s1816_s12 = sld [smem:[#allocation17_spill]] }
  0x2b   :  { %271 = vmatpush.bf16.msra.mxu0 %v1058_v12  ;;  %v1030_v44 = vor.u32 %v1348_v41, %v1027_v42  ;;  %v1346_v46 = vld [vmem:[#allocation2 + $0x4] sm:$0xf]  ;;  %v1369_v49 = vld [vmem:[#allocation4 + $0x38] sm:$0xff]  ;;  %v1368_v50 = vld [vmem:[#allocation4 + $0x30] sm:$0xff]  ;;  %vm303_vm0 = vcmask 130048  }
  0x2c   :  { %v1022_v48 = vor.u32 %v1346_v46, %v1019_v47  ;;  %398 = vmatpush.bf16.msra.mxu3 %v1369_v49  ;;  %v1367_v55 = vld [vmem:[#allocation4 + $0x28] sm:$0xff]  ;;  %v1366_v56 = vld [vmem:[#allocation4 + $0x20] sm:$0xff]  ;;  %v1365_v57 = vld [vmem:[#allocation4 + $0x18] sm:$0xff] }
  0x2d   :  { %285 = vmatpush.bf16.msra.mxu1 %v1062_v22  ;;  %v1364_v58 = vld [vmem:[#allocation4 + $0x10] sm:$0xff]  ;;  %v1363_v59 = vld [vmem:[#allocation4 + $0x8] sm:$0xff]  ;;  %v1362_v60 = vld [vmem:[#allocation4] sm:$0xff] }
  0x2e   :  { %v1174_v61 = vld [vmem:[#allocation6 + $0x70] sm:$0xf]  ;;  %v1385_v62 = vld [vmem:[#allocation6 + $0x74] sm:$0xf0]  ;;  %v1384_v63 = vld [vmem:[#allocation6 + $0x74] sm:$0xf] }
  0x2f   :  { %272 = vmatpush.bf16.msra.mxu0 %v1050_v20  ;;  %v1175_v0 = vor.u32 %v1385_v62, %v1174_v61  ;;  %v1176_v1 = vld [vmem:[#allocation6 + $0x78] sm:$0xf0]  ;;  %v1166_v2 = vld [vmem:[#allocation6 + $0x60] sm:$0xf]  ;;  %v1383_v3 = vld [vmem:[#allocation6 + $0x64] sm:$0xf0] }
  0x30   :  { %399 = vmatpush.bf16.msra.mxu3 %v1368_v50  ;;  %v1763_v54 = vld [vmem:[%s1816_s12] sm:$0xff]  ;;  %v1179_v4 = vor.u32 %v1384_v63, %v1176_v1  ;;  %v1168_v6 = vld [vmem:[#allocation6 + $0x68] sm:$0xf0]  ;;  %v1167_v7 = vor.u32 %v1383_v3, %v1166_v2  ;;  %v1158_v9 = vld [vmem:[#allocation6 + $0x50] sm:$0xf] }
  0x31   :  { %286 = vmatpush.bf16.msra.mxu1 %v1054_v28  ;;  %v1382_v5 = vld [vmem:[#allocation6 + $0x64] sm:$0xf]  ;;  %511 = vmatpush.bf16.msra.mxu2 %v1175_v0  ;;  %v1381_v10 = vld [vmem:[#allocation6 + $0x54] sm:$0xf0]  ;;  %v1380_v11 = vld [vmem:[#allocation6 + $0x54] sm:$0xf] }
  0x32   :  { %v1171_v8 = vor.u32 %v1382_v5, %v1168_v6  ;;  %v1160_v12 = vld [vmem:[#allocation6 + $0x58] sm:$0xf0]  ;;  %v1159_v13 = vor.u32 %v1381_v10, %v1158_v9  ;;  %v1150_v15 = vld [vmem:[#allocation6 + $0x40] sm:$0xf]  ;;  %v1379_v16 = vld [vmem:[#allocation6 + $0x44] sm:$0xf0] }
  0x33   :  { %273 = vmatpush.bf16.msra.mxu0 %v1042_v25  ;;  %v1163_v14 = vor.u32 %v1380_v11, %v1160_v12  ;;  %v1378_v17 = vld [vmem:[#allocation6 + $0x44] sm:$0xf]  ;;  %v1152_v18 = vld [vmem:[#allocation6 + $0x48] sm:$0xf0]  ;;  %v1151_v19 = vor.u32 %v1379_v16, %v1150_v15  ;;  %v1437_v24 = vld [vmem:[%s1801_s3] ss:$0 sm:$0xff] }
  0x34   :  { %400 = vmatpush.bf16.msra.mxu3 %v1367_v55  ;;  %v1155_v20 = vor.u32 %v1378_v17, %v1152_v18  ;;  %v1142_v33 = vld [vmem:[#allocation6 + $0x30] sm:$0xf]  ;;  %v1376_v35 = vld [vmem:[#allocation6 + $0x34] sm:$0xf]  ;;  %v1134_v39 = vld [vmem:[#allocation6 + $0x20] sm:$0xf] }
  0x35   :  { %287 = vmatpush.bf16.msra.mxu1 %v1046_v34  ;;  %512 = vmatpush.bf16.msra.mxu2 %v1167_v7  ;;  %v1377_v34 = vld [vmem:[#allocation6 + $0x34] sm:$0xf0]  ;;  %v1374_v41 = vld [vmem:[#allocation6 + $0x24] sm:$0xf]  ;;  %v1372_v47 = vld [vmem:[#allocation6 + $0x14] sm:$0xf] }
  0x36   :  { %v1143_v36 = vor.u32 %v1377_v34, %v1142_v33  ;;  %v1373_v46 = vld [vmem:[#allocation6 + $0x14] sm:$0xf0]  ;;  %v1128_v49 = vld [vmem:[#allocation6 + $0x18] sm:$0xf0]  ;;  %v1392_v3 = vld [vmem:[#allocation7 + $0x30] sm:$0xff] }
  0x37   :  { %274 = vmatpush.bf16.msra.mxu0 %v1034_v31  ;;  %v1131_v50 = vor.u32 %v1372_v47, %v1128_v49  ;;  %v1393_v2 = vld [vmem:[#allocation7 + $0x38] sm:$0xff]  ;;  %v1390_v5 = vld [vmem:[#allocation7 + $0x20] sm:$0xff]  ;;  %v1388_v10 = vld [vmem:[#allocation7 + $0x10] sm:$0xff] }
  0x38   :  { %401 = vmatpush.bf16.msra.mxu3 %v1366_v56  ;;  %v1120_v56 = vld [vmem:[#allocation6 + $0x8] sm:$0xf0]  ;;  %v1389_v9 = vld [vmem:[#allocation7 + $0x18] sm:$0xff]  ;;  %v1386_v12 = vld [vmem:[#allocation7] sm:$0xff] }
  0x39   :  { %288 = vmatpush.bf16.msra.mxu1 %v1038_v40  ;;  %513 = vmatpush.bf16.msra.mxu2 %v1159_v13  ;;  %v1375_v40 = vld [vmem:[#allocation6 + $0x24] sm:$0xf0]  ;;  %v1271_v13 = vld [vmem:[#allocation9 + $0x70] sm:$0xf]  ;;  %v1408_v15 = vld [vmem:[#allocation9 + $0x74] sm:$0xf] }
  0x3a   :  { %v1135_v42 = vor.u32 %v1375_v40, %v1134_v39  ;;  %v1387_v11 = vld [vmem:[#allocation7 + $0x8] sm:$0xff]  ;;  %v1273_v17 = vld [vmem:[#allocation9 + $0x78] sm:$0xf0]  ;;  %v1263_v18 = vld [vmem:[#allocation9 + $0x60] sm:$0xf] }
  0x3b   :  { %275 = vmatpush.bf16.msra.mxu0 %v1026_v37  ;;  %v1144_v37 = vld [vmem:[#allocation6 + $0x38] sm:$0xf0]  ;;  %v1402_v33 = vld [vmem:[#allocation9 + $0x44] sm:$0xf]  ;;  %v1249_v34 = vld [vmem:[#allocation9 + $0x48] sm:$0xf0] }
  0x3c   :  { %402 = vmatpush.bf16.msra.mxu3 %v1365_v57  ;;  %v1147_v38 = vor.u32 %v1376_v35, %v1144_v37  ;;  %v1439_v40 = vld [vmem:[%s1805_s7] ss:$0 sm:$0xff]  ;;  %v1239_v49 = vld [vmem:[#allocation9 + $0x30] sm:$0xf] }
  0x3d   :  { %289 = vmatpush.bf16.msra.mxu1 %v1030_v44  ;;  %514 = vmatpush.bf16.msra.mxu2 %v1151_v19  ;;  %v1407_v19 = vld [vmem:[#allocation9 + $0x64] sm:$0xf0] }
  0x3f   :  { %276 = vmatpush.bf16.msra.mxu0 %v1018_v43  ;;  %v1136_v43 = vld [vmem:[#allocation6 + $0x28] sm:$0xf0] }
  0x40   :  { %403 = vmatpush.bf16.msra.mxu3 %v1364_v58  ;;  %v1139_v44 = vor.u32 %v1374_v41, %v1136_v43 }
  0x41   :  { %290 = vmatpush.bf16.msra.mxu1 %v1022_v48  ;;  %515 = vmatpush.bf16.msra.mxu2 %v1143_v36  ;;  %v1252_v36 = vor.u32 %v1402_v33, %v1249_v34 }
  0x42   :  { %277 = vmatmul.bf16.vlgmr.msra.gmra.mxu0 %v1345_v45 }
  0x44   :  { %291 = vmatmul.bf16.vlgmr.msra.gmra.mxu1 %v1345_v45  ;;  %404 = vmatpush.bf16.msra.mxu3 %v1363_v59  ;;  %v1126_v45 = vld [vmem:[#allocation6 + $0x10] sm:$0xf]  ;;  %v1438_v59 = vld [vmem:[%s1803_s5] ss:$0 sm:$0xff] }
  0x45   :  { %516 = vmatpush.bf16.msra.mxu2 %v1135_v42  ;;  %v1127_v48 = vor.u32 %v1373_v46, %v1126_v45 }
  0x48   :  { %405 = vmatpush.bf16.msra.mxu3 %v1362_v60 }
  0x49   :  { %517 = vmatpush.bf16.msra.mxu2 %v1127_v48 }
  0x4c   :  { %631 = vmatpush.bf16.msrb.mxu3 %v1393_v2  ;;  %v1225_v2 = vld [vmem:[#allocation9 + $0x18] sm:$0xf0] }
  0x50   :  { %632 = vmatpush.bf16.msrb.mxu3 %v1392_v3 }
  0xbf   :  { %v278_v51 = vpop.f32.mrf.mxu0 }
  0xc1   :  { %v292_v21 = vpop.f32.mrf.mxu1 }
  0xc7   :  { %v280_v52 = vpop.f32.mrf.mxu0 }
  0xc8   :  { %v297_v53 = vpack.c.bf16 %v280_v52, %v278_v51  ;;  %v1118_v51 = vld [vmem:[#allocation6] sm:$0xf]  ;;  %v1371_v52 = vld [vmem:[#allocation6 + $0x4] sm:$0xf0] }
  0xc9   :  { %v294_v25 = vpop.f32.mrf.mxu1  ;;  %v1119_v55 = vor.u32 %v1371_v52, %v1118_v51  ;;  %v1400_v51 = vld [vmem:[#allocation9 + $0x34] sm:$0xf] }
  0xca   :  { %314 = vmatpush.bf16.msrb.mxu0 %v297_v53  ;;  %v1370_v53 = vld [vmem:[#allocation6 + $0x4] sm:$0xf] }
  0xcb   :  { %v1123_v57 = vor.u32 %v1370_v53, %v1120_v56  ;;  %518 = vmatpush.bf16.msra.mxu2 %v1119_v55  ;;  %v1241_v53 = vld [vmem:[#allocation9 + $0x38] sm:$0xf0]  ;;  %v1231_v56 = vld [vmem:[#allocation9 + $0x20] sm:$0xf] }
  0xcc   :  { %v1244_v55 = vor.u32 %v1400_v51, %v1241_v53 }
  0xcd   :  { %1083 = vmatmul.msk.bf16.vlgmr.msrb.gmra.mxu0 %vm303_vm0, %v1763_v54 }
  0xce   :  { %525 = vmatpush.bf16.msra.mxu0 %v1179_v4  ;;  %v1391_v4 = vld [vmem:[#allocation7 + $0x28] sm:$0xff] }
  0xcf   :  { %633 = vmatpush.bf16.msrb.mxu3 %v1391_v4  ;;  %v1215_v4 = vld [vmem:[#allocation9] sm:$0xf] }
  0xd2   :  { %526 = vmatpush.bf16.msra.mxu0 %v1171_v8 }
  0xd3   :  { %634 = vmatpush.bf16.msrb.mxu3 %v1390_v5  ;;  %v1395_v5 = vld [vmem:[#allocation9 + $0x4] sm:$0xf0] }
  0xd6   :  { %527 = vmatpush.bf16.msra.mxu0 %v1163_v14  ;;  %v1409_v14 = vld [vmem:[#allocation9 + $0x74] sm:$0xf0] }
  0xd7   :  { %635 = vmatpush.bf16.msrb.mxu3 %v1389_v9  ;;  %v1272_v16 = vor.u32 %v1409_v14, %v1271_v13 }
  0xd9   :  { %744 = vmatpush.bf16.msrb.mxu2 %v1272_v16 }
  0xda   :  { %528 = vmatpush.bf16.msra.mxu0 %v1155_v20  ;;  %v1276_v20 = vor.u32 %v1408_v15, %v1273_v17 }
  0xdb   :  { %636 = vmatpush.bf16.msrb.mxu3 %v1388_v10 }
  0xde   :  { %529 = vmatpush.bf16.msra.mxu0 %v1147_v38 }
  0xdf   :  { %637 = vmatpush.bf16.msrb.mxu3 %v1387_v11  ;;  %v1440_v11 = vld [vmem:[%s1807_s9] ss:$0 sm:$0xff] }
  0xe2   :  { %530 = vmatpush.bf16.msra.mxu0 %v1139_v44 }
  0xe3   :  { %638 = vmatpush.bf16.msrb.mxu3 %v1386_v12 }
  0xe6   :  { %531 = vmatpush.bf16.msra.mxu0 %v1131_v50  ;;  %v1401_v50 = vld [vmem:[#allocation9 + $0x34] sm:$0xf0] }
  0xe7   :  { %v1240_v52 = vor.u32 %v1401_v50, %v1239_v49  ;;  %v1442_v49 = vld [vmem:[%s1811_s13] ss:$0 sm:$0xff] }
  0xea   :  { %532 = vmatpush.bf16.msra.mxu0 %v1123_v57  ;;  %v1399_v57 = vld [vmem:[#allocation9 + $0x24] sm:$0xf0] }
 0x14a   :  { %v316_v22 = vpop.f32.mrf.mxu0 }
 0x14b   :  { %v317_v23 = vadd.f32 %v316_v22, %v292_v21  ;;  %v1406_v21 = vld [vmem:[#allocation9 + $0x64] sm:$0xf]  ;;  %v1265_v22 = vld [vmem:[#allocation9 + $0x68] sm:$0xf0] }
 0x14d   :  { %v325_v27 = vadd.f32 %v1437_v24, %v317_v23  ;;  %v1264_v23 = vor.u32 %v1407_v19, %v1263_v18  ;;  %v1417_v18 = vld [vmem:[#allocation10 + $0x38] sm:$0xff]  ;;  %v1416_v19 = vld [vmem:[#allocation10 + $0x30] sm:$0xff] }
 0x14f   :  { %v327_v30 = vmax.f32 %v325_v27, 0.0  ;;  %v1404_v27 = vld [vmem:[#allocation9 + $0x54] sm:$0xf]  ;;  %745 = vmatpush.bf16.msrb.mxu2 %v1264_v23 }
 0x152   :  { %v318_v26 = vpop.f32.mrf.mxu0 }
 0x153   :  { %v319_v28 = vadd.f32 %v318_v26, %v294_v25  ;;  %v1255_v25 = vld [vmem:[#allocation9 + $0x50] sm:$0xf]  ;;  %v1405_v26 = vld [vmem:[#allocation9 + $0x54] sm:$0xf0] }
 0x155   :  { %v326_v29 = vadd.f32 %v1437_v24, %v319_v28  ;;  %v1268_v24 = vor.u32 %v1406_v21, %v1265_v22  ;;  %v1257_v28 = vld [vmem:[#allocation9 + $0x58] sm:$0xf0]  ;;  %v1414_v21 = vld [vmem:[#allocation10 + $0x20] sm:$0xff] }
 0x157   :  { %v328_v31 = vmax.f32 %v326_v29, 0.0  ;;  %v1256_v29 = vor.u32 %v1405_v26, %v1255_v25  ;;  %v1413_v25 = vld [vmem:[#allocation10 + $0x18] sm:$0xff]  ;;  %v1412_v26 = vld [vmem:[#allocation10 + $0x10] sm:$0xff] }
 0x159   :  { %v329_v32 = vpack.c.bf16 %v328_v31, %v327_v30  ;;  %v1260_v30 = vor.u32 %v1404_v27, %v1257_v28  ;;  %v1247_v31 = vld [vmem:[#allocation9 + $0x40] sm:$0xf]  ;;  %746 = vmatpush.bf16.msrb.mxu2 %v1256_v29  ;;  %v1411_v27 = vld [vmem:[#allocation10 + $0x8] sm:$0xff]  ;;  %v1425_v29 = vld [vmem:[#allocation12 + $0x38] sm:$0xff] }
 0x15a   :  { %v1410_v28 = vld [vmem:[#allocation10] sm:$0xff] }
 0x15b   :  { %406 = vmatmul.bf16.vlgmr.msra.gmra.mxu3 %v329_v32  ;;  %v1403_v32 = vld [vmem:[#allocation9 + $0x44] sm:$0xf0] }
 0x15c   :  { %v1248_v35 = vor.u32 %v1403_v32, %v1247_v31  ;;  %864 = vmatpush.bf16.msra.mxu3 %v1417_v18  ;;  %v1423_v31 = vld [vmem:[#allocation12 + $0x28] sm:$0xff]  ;;  %v1422_v32 = vld [vmem:[#allocation12 + $0x20] sm:$0xff] }
 0x15e   :  { %747 = vmatpush.bf16.msrb.mxu2 %v1248_v35 }
 0x160   :  { %865 = vmatpush.bf16.msra.mxu3 %v1416_v19 }
 0x162   :  { %748 = vmatpush.bf16.msrb.mxu2 %v1240_v52 }
 0x1de   :  { %v407_v58 = vpop.f32.mrf.mxu3 }
 0x1df   :  { %v408_v60 = vadd.f32 %v1438_v59, %v407_v58  ;;  %v1398_v58 = vld [vmem:[#allocation9 + $0x24] sm:$0xf] }
 0x1e1   :  { %v412_v63 = vmax.f32 %v408_v60, 0.0  ;;  %v1233_v60 = vld [vmem:[#allocation9 + $0x28] sm:$0xf0] }
 0x1e6   :  { %v409_v61 = vpop.f32.mrf.mxu3 }
 0x1e7   :  { %v410_v62 = vadd.f32 %v1438_v59, %v409_v61  ;;  %v1232_v59 = vor.u32 %v1399_v57, %v1231_v56  ;;  %v1236_v61 = vor.u32 %v1398_v58, %v1233_v60  ;;  %v1443_v57 = vld [vmem:[%s1813_s15] ss:$0 sm:$0xff] }
 0x1e9   :  { %v413_v0 = vmax.f32 %v410_v62, 0.0  ;;  %749 = vmatpush.bf16.msrb.mxu2 %v1232_v59  ;;  %v1223_v62 = vld [vmem:[#allocation9 + $0x10] sm:$0xf] }
 0x1eb   :  { %v414_v1 = vpack.c.bf16 %v413_v0, %v412_v63  ;;  %v1397_v63 = vld [vmem:[#allocation9 + $0x14] sm:$0xf0]  ;;  %v1396_v0 = vld [vmem:[#allocation9 + $0x14] sm:$0xf] }
 0x1ec   :  { %v1228_v3 = vor.u32 %v1396_v0, %v1225_v2 }
 0x1ed   :  { %519 = vmatmul.bf16.vlgmr.msra.gmra.mxu2 %v414_v1  ;;  %533 = vmatmul.bf16.vlgmr.msra.gmra.mxu0 %v414_v1  ;;  %v1224_v1 = vor.u32 %v1397_v63, %v1223_v62 }
 0x1ef   :  { %750 = vmatpush.bf16.msrb.mxu2 %v1224_v1 }
 0x26a   :  { %v534_v37 = vpop.f32.mrf.mxu0 }
 0x270   :  { %v520_v6 = vpop.f32.mrf.mxu2 }
 0x272   :  { %v536_v41 = vpop.f32.mrf.mxu0 }
 0x278   :  { %v522_v7 = vpop.f32.mrf.mxu2 }
 0x279   :  { %v539_v8 = vpack.c.bf16 %v522_v7, %v520_v6  ;;  %v1394_v6 = vld [vmem:[#allocation9 + $0x4] sm:$0xf]  ;;  %v1216_v7 = vor.u32 %v1395_v5, %v1215_v4 }
 0x27b   :  { %547 = vmatpush.bf16.msrb.mxu1 %v539_v8  ;;  %v1217_v8 = vld [vmem:[#allocation9 + $0x8] sm:$0xf0]  ;;  %751 = vmatpush.bf16.msrb.mxu2 %v1216_v7 }
 0x27c   :  { %v1220_v9 = vor.u32 %v1394_v6, %v1217_v8 }
 0x27e   :  { %1180 = vmatmul.msk.bf16.vlgmr.msrb.gmra.mxu1 %vm303_vm0, %v1763_v54 }
 0x27f   :  { %758 = vmatpush.bf16.msra.mxu1 %v1276_v20  ;;  %v1415_v20 = vld [vmem:[#allocation10 + $0x28] sm:$0xff]  ;;  %949 = vmatpush.bf16.msra.mxu2 %v1425_v29 }
 0x280   :  { %866 = vmatpush.bf16.msra.mxu3 %v1415_v20 }
 0x283   :  { %759 = vmatpush.bf16.msra.mxu1 %v1268_v24 }
 0x284   :  { %867 = vmatpush.bf16.msra.mxu3 %v1414_v21 }
 0x287   :  { %760 = vmatpush.bf16.msra.mxu1 %v1260_v30  ;;  %v1424_v30 = vld [vmem:[#allocation12 + $0x30] sm:$0xff] }
 0x288   :  { %868 = vmatpush.bf16.msra.mxu3 %v1413_v25  ;;  %950 = vmatpush.bf16.msra.mxu2 %v1424_v30 }
 0x28b   :  { %761 = vmatpush.bf16.msra.mxu1 %v1252_v36 }
 0x28c   :  { %869 = vmatpush.bf16.msra.mxu3 %v1412_v26  ;;  %951 = vmatpush.bf16.msra.mxu2 %v1423_v31 }
 0x28f   :  { %762 = vmatpush.bf16.msra.mxu1 %v1244_v55 }
 0x290   :  { %870 = vmatpush.bf16.msra.mxu3 %v1411_v27  ;;  %952 = vmatpush.bf16.msra.mxu2 %v1422_v32 }
 0x293   :  { %763 = vmatpush.bf16.msra.mxu1 %v1236_v61 }
 0x294   :  { %871 = vmatpush.bf16.msra.mxu3 %v1410_v28 }
 0x297   :  { %764 = vmatpush.bf16.msra.mxu1 %v1228_v3 }
 0x29b   :  { %765 = vmatpush.bf16.msra.mxu1 %v1220_v9 }
 0x2fb   :  { %v549_v38 = vpop.f32.mrf.mxu1 }
 0x2fc   :  { %v550_v39 = vadd.f32 %v549_v38, %v534_v37 }
 0x2fe   :  { %v558_v43 = vadd.f32 %v1439_v40, %v550_v39 }
 0x300   :  { %v560_v46 = vmax.f32 %v558_v43, 0.0 }
 0x303   :  { %v551_v42 = vpop.f32.mrf.mxu1 }
 0x304   :  { %v552_v44 = vadd.f32 %v551_v42, %v536_v41 }
 0x306   :  { %v559_v45 = vadd.f32 %v1439_v40, %v552_v44  ;;  %v1421_v44 = vld [vmem:[#allocation12 + $0x18] sm:$0xff] }
 0x307   :  { %953 = vmatpush.bf16.msra.mxu2 %v1421_v44 }
 0x308   :  { %v561_v47 = vmax.f32 %v559_v45, 0.0  ;;  %v1420_v45 = vld [vmem:[#allocation12 + $0x10] sm:$0xff] }
 0x30a   :  { %v562_v48 = vpack.c.bf16 %v561_v47, %v560_v46  ;;  %v1419_v46 = vld [vmem:[#allocation12 + $0x8] sm:$0xff]  ;;  %v1418_v47 = vld [vmem:[#allocation12] sm:$0xff] }
 0x30b   :  { %954 = vmatpush.bf16.msra.mxu2 %v1420_v45 }
 0x30c   :  { %639 = vmatmul.bf16.vlgmr.msrb.gmra.mxu3 %v562_v48 }
 0x30f   :  { %955 = vmatpush.bf16.msra.mxu2 %v1419_v46 }
 0x313   :  { %956 = vmatpush.bf16.msra.mxu2 %v1418_v47 }
 0x38f   :  { %v640_v10 = vpop.f32.mrf.mxu3 }
 0x390   :  { %v641_v12 = vadd.f32 %v1440_v11, %v640_v10 }
 0x392   :  { %v645_v15 = vmax.f32 %v641_v12, 0.0 }
 0x397   :  { %v642_v13 = vpop.f32.mrf.mxu3 }
 0x398   :  { %v643_v14 = vadd.f32 %v1440_v11, %v642_v13 }
 0x39a   :  { %v646_v16 = vmax.f32 %v643_v14, 0.0 }
 0x39c   :  { %v647_v17 = vpack.c.bf16 %v646_v16, %v645_v15 }
 0x39e   :  { %752 = vmatmul.bf16.vlgmr.msrb.gmra.mxu2 %v647_v17  ;;  %766 = vmatmul.bf16.vlgmr.msra.gmra.mxu1 %v647_v17 }
 0x41b   :  { %v767_v33 = vpop.f32.mrf.mxu1 }
 0x421   :  { %v753_v22 = vpop.f32.mrf.mxu2 }
 0x423   :  { %v769_v36 = vpop.f32.mrf.mxu1 }
 0x429   :  { %v755_v23 = vpop.f32.mrf.mxu2 }
 0x42a   :  { %v772_v24 = vpack.c.bf16 %v755_v23, %v753_v22 }
 0x42c   :  { %780 = vmatpush.bf16.msrb.mxu0 %v772_v24 }
 0x42f   :  { %1277 = vmatmul.msk.bf16.vlgmr.msrb.gmra.mxu0 %vm303_vm0, %v1763_v54  ;;  %v1441_v54 = vld [vmem:[%s1809_s11] ss:$0 sm:$0xff] }
 0x4ac   :  { %v782_v34 = vpop.f32.mrf.mxu0 }
 0x4ad   :  { %v783_v35 = vadd.f32 %v782_v34, %v767_v33 }
 0x4af   :  { %v791_v38 = vadd.f32 %v1441_v54, %v783_v35 }
 0x4b1   :  { %v793_v41 = vmax.f32 %v791_v38, 0.0 }
 0x4b4   :  { %v784_v37 = vpop.f32.mrf.mxu0 }
 0x4b5   :  { %v785_v39 = vadd.f32 %v784_v37, %v769_v36 }
 0x4b7   :  { %v792_v40 = vadd.f32 %v1441_v54, %v785_v39 }
 0x4b9   :  { %v794_v42 = vmax.f32 %v792_v40, 0.0 }
 0x4bb   :  { %v795_v43 = vpack.c.bf16 %v794_v42, %v793_v41 }
 0x4bd   :  { %872 = vmatmul.bf16.vlgmr.msra.gmra.mxu3 %v795_v43 }
 0x540   :  { %v873_v48 = vpop.f32.mrf.mxu3 }
 0x541   :  { %v874_v50 = vadd.f32 %v1442_v49, %v873_v48 }
 0x543   :  { %v878_v53 = vmax.f32 %v874_v50, 0.0 }
 0x548   :  { %v875_v51 = vpop.f32.mrf.mxu3 }
 0x549   :  { %v876_v52 = vadd.f32 %v1442_v49, %v875_v51 }
 0x54b   :  { %v879_v55 = vmax.f32 %v876_v52, 0.0 }
 0x54d   :  { %v880_v56 = vpack.c.bf16 %v879_v55, %v878_v53 }
 0x54f   :  { %957 = vmatmul.bf16.vlgmr.msra.gmra.mxu2 %v880_v56 }
 0x5d2   :  { %v958_v58 = vpop.f32.mrf.mxu2 }
 0x5d3   :  { %v959_v59 = vadd.f32 %v1443_v57, %v958_v58 }
 0x5d5   :  { %v1342_v60 = vmul.f32 -1.442695, %v959_v59 }
 0x5d7   :  { %1444 = vpow2.f32 %v1342_v60 }
 0x5da   :  { %v960_v61 = vpop.f32.mrf.mxu2 }
 0x5db   :  { %v961_v62 = vadd.f32 %v1443_v57, %v960_v61 }
 0x5dd   :  { %v1445_v63 = vpop.eup %1444  ;;  %v1343_v0 = vmul.f32 -1.442695, %v961_v62 }
 0x5de   :  { %v969_v1 = vadd.f32 1.0, %v1445_v63 }
 0x5df   :  { %1446 = vpow2.f32 %v1343_v0 }
 0x5e0   :  { %1448 = vrcp.f32 %v969_v1  ;;  %v982_v7 = vand.u32 2147483648, %v969_v1  ;;  %v980_v9 = vand.u32 2147483647, %v969_v1  ;;  %vm976_vm2 = vweird.f32 %v969_v1 }
 0x5e2   :  { %v983_v12 = vor.u32 1.1754944e-38, %v982_v7  ;;  %vm981_vm4 = vcmp.eq.f32.partialorder %v980_v9, 8.507059e+37 }
 0x5e5   :  { %v1447_v2 = vpop.eup %1446 }
 0x5e6   :  { %v1449_v3 = vpop.eup %1448  ;;  %v970_v4 = vadd.f32 1.0, %v1447_v2 }
 0x5e7   :  { %v972_v5 = vmul.f32 %v1449_v3, %v969_v1  ;;  %vm977_vm1 = vweird.f32 %v1449_v3 }
 0x5e8   :  { %1450 = vrcp.f32 %v970_v4  ;;  %vm978_vm3 = vmor %vm976_vm2, %vm977_vm1  ;;  %v997_v17 = vand.u32 2147483648, %v970_v4  ;;  %v995_v19 = vand.u32 2147483647, %v970_v4  ;;  %vm991_vm6 = vweird.f32 %v970_v4 }
 0x5e9   :  { %v973_v6 = vsub.f32 1.0, %v972_v5 }
 0x5ea   :  { %v998_v21 = vor.u32 1.1754944e-38, %v997_v17  ;;  %vm996_vm8 = vcmp.eq.f32.partialorder %v995_v19, 8.507059e+37 }
 0x5eb   :  { %v974_v8 = vmul.f32 %v1449_v3, %v973_v6 }
 0x5ed   :  { %v975_v10 = vadd.f32 %v1449_v3, %v974_v8 }
 0x5ee   :  { %v1451_v11 = vpop.eup %1450 }
 0x5ef   :  { %v979_v13 = vsel %vm978_vm3, %v1449_v3, %v975_v10  ;;  %v987_v14 = vmul.f32 %v1451_v11, %v970_v4  ;;  %vm992_vm5 = vweird.f32 %v1451_v11 }
 0x5f0   :  { %v984_v15 = vsel %vm981_vm4, %v983_v12, %v979_v13  ;;  %vm993_vm7 = vmor %vm991_vm6, %vm992_vm5 }
 0x5f1   :  { %1001 = vst [vmem:[%s1814_s16] sm:$0xff] %v984_v15  ;;  %v988_v16 = vsub.f32 1.0, %v987_v14 }
 0x5f3   :  { %v989_v18 = vmul.f32 %v1451_v11, %v988_v16 }
 0x5f5   :  { %v990_v20 = vadd.f32 %v1451_v11, %v989_v18 }
 0x5f7   :  { %v994_v22 = vsel %vm993_vm7, %v1451_v11, %v990_v20 }
 0x5f8   :  { %v999_v23 = vsel %vm996_vm8, %v998_v21, %v994_v22 }
 0x5f9   :  { %1002 = vst [vmem:[%s1814_s16 + $0x8] sm:$0xff] %v999_v23 }
 0x5fa   :  { %1007 = vsyncpa [#allocation3], 1 }
 0x5fb   :  { %1008 = vsyncpa [#allocation5], 1 }
 0x5fc   :  { %1009 = vsyncpa [#allocation8], 1 }
 0x5fd   :  { %1010 = vsyncpa [#allocation11], 1 }

</bundles_post_ra>
